<compile_context>
chip_gen: v6e
topology: v6e:2x2x1
jax: 0.10.0
libtpu: 0.0.40
codegen_flags: <defaults>
</compile_context>

<pallas_src>
import functools

import jax
import jax.numpy as jnp
from jax.experimental import pallas as pl
from jax.experimental.pallas import tpu as pltpu

LANE = 128


def _round_up(n: int, m: int) -> int:
    return ((n + m - 1) // m) * m


# ---------------------------------------------------------------------------
# Kernel: whole folded MLP for one batch tile; all weights VMEM-resident.
# ---------------------------------------------------------------------------
def _fused_mlp_kernel(
    x_ref,
    w1_ref, b1_ref,
    w2_ref, b2_ref,
    w3_ref, b3_ref,
    w4_ref, b4_ref,
    out_ref,
):
    def hidden(h_bf16, w_ref, b_ref):
        # bf16 x bf16 -> f32 on the MXU; bias + ReLU stay in f32 on the VPU.
        z = jnp.dot(h_bf16, w_ref[...], preferred_element_type=jnp.float32)
        z = jnp.maximum(z + b_ref[...], 0.0)
        return z.astype(jnp.bfloat16)   # down-cast only for the next MXU pass

    h = x_ref[...]                      # already bf16 (cast once in the wrapper)
    h = hidden(h, w1_ref, b1_ref)
    h = hidden(h, w2_ref, b2_ref)
    h = hidden(h, w3_ref, b3_ref)
    out = jnp.dot(h, w4_ref[...], preferred_element_type=jnp.float32) + b4_ref[...]
    out_ref[...] = out                  # lane-dense (N padded to 128) f32 store


# ---------------------------------------------------------------------------
# Parameter construction (PyTorch-style) and one-time fold / pad / bf16 cast.
# ---------------------------------------------------------------------------
def init_params(key, input_dim, hidden_dims=(512, 256, 128), output_dim=96):
    """Raw module parameters: Linear (W, b) + BatchNorm1d (gamma, beta, mean, var)."""
    dims = [input_dim] + list(hidden_dims) + [output_dim]
    params = {"linears": [], "bns": []}
    for i in range(len(dims) - 1):
        fan_in, fan_out = dims[i], dims[i + 1]
        key, kw, kb = jax.random.split(key, 3)
        bound = 1.0 / float(fan_in) ** 0.5
        w = jax.random.uniform(kw, (fan_in, fan_out), jnp.float32, -bound, bound)
        b = jax.random.uniform(kb, (fan_out,), jnp.float32, -bound, bound)
        params["linears"].append((w, b))
        if i < len(hidden_dims):   # BatchNorm1d only after hidden layers
            key, kg, kbeta, km, kv = jax.random.split(key, 5)
            gamma = 1.0 + 0.1 * jax.random.normal(kg, (fan_out,), jnp.float32)
            beta = 0.1 * jax.random.normal(kbeta, (fan_out,), jnp.float32)
            mean = 0.1 * jax.random.normal(km, (fan_out,), jnp.float32)
            var = 1.0 + 0.1 * jax.random.uniform(kv, (fan_out,), jnp.float32)
            params["bns"].append((gamma, beta, mean, var))
    return params


def fold_and_pad_params(params, eps=1e-5):
    """One-time transform:
       * fold eval-mode BN of hidden layer i into layer i+1:
           W'_{i+1} = diag(sc_i) @ W_{i+1},  b'_{i+1} = sh_i @ W_{i+1} + b_{i+1}
       * zero-pad ONLY the last-layer N to a lane multiple (128) for a
         lane-dense output store (no K padding of the first layer: the kernel
         uses a full-last-dim input block instead)
       * cast weights to bf16, keep biases in f32 with shape (1, H).
    """
    linears = [(w.astype(jnp.float32), b.astype(jnp.float32))
               for w, b in params["linears"]]
    folded = [list(linears[0])]
    for i, (gamma, beta, mean, var) in enumerate(params["bns"]):
        sc = gamma / jnp.sqrt(var + eps)
        sh = beta - mean * sc
        w_next, b_next = linears[i + 1]
        folded.append([w_next * sc[:, None], sh @ w_next + b_next])

    # Pad last-layer N (outputs) to a multiple of 128 (lane-dense store).
    w_last, b_last = folded[-1]
    n_pad = _round_up(w_last.shape[1], LANE) - w_last.shape[1]
    if n_pad:
        w_last = jnp.pad(w_last, ((0, 0), (0, n_pad)))
        b_last = jnp.pad(b_last, ((0, n_pad),))
    folded[-1] = [w_last, b_last]

    return [(w.astype(jnp.bfloat16), b.reshape(1, -1).astype(jnp.float32))
            for w, b in folded]


# ---------------------------------------------------------------------------
# Pallas wrapper: batch-tiled "parallel" grid, weights resident across steps.
# ---------------------------------------------------------------------------
@functools.partial(jax.jit, static_argnames=("output_dim", "tm_max", "full_output"))
def direct_net_load_predictor(x, fused_params, output_dim=96, tm_max=512,
                              full_output=False):
    (w1, b1), (w2, b2), (w3, b3), (w4, b4) = fused_params

    batch, in_dim = x.shape
    assert in_dim == w1.shape[0], "input feature dim mismatch"
    n_p = w4.shape[1]                      # lane-padded output dim
    h1, h2, h3 = w1.shape[1], w2.shape[1], w3.shape[1]

    # Stream the input in bf16: one cast, no padded HBM copy of x.
    x_bf = x.astype(jnp.bfloat16)

    # Batch tile: multiple of 16 (bf16 sublane packing), capped at tm_max
    # (sweep 512-1024 on v6e, 256-512 on v5e), and also capped near
    # ceil(batch/2) so moderate/large batches produce >= 2 grid steps and the
    # "parallel" axis can occupy both v7x TensorCores.
    tm = min(tm_max, _round_up(max(pl.cdiv(batch, 2), 1), 16))
    tm = min(tm, _round_up(batch, 16))
    grid = pl.cdiv(batch, tm)              # partial last tile: masked store

    flat = (x_bf, w1, b1, w2, b2, w3, b3, w4, b4)

    def const_spec(a):
        # Full-array block, constant index -> fetched once, VMEM-resident
        # across all grid iterations.
        return pl.BlockSpec(a.shape, lambda i: (0,) * a.ndim)

    flops = 2 * batch * (in_dim * h1 + h1 * h2 + h2 * h3 + h3 * n_p)
    bytes_accessed = (
        int(x_bf.size) * 2 + batch * n_p * 4
        + sum(int(w.size) * 2 + int(b.size) * 4 for w, b in fused_params)
    )

    out = pl.pallas_call(
        _fused_mlp_kernel,
        out_shape=jax.ShapeDtypeStruct((batch, n_p), jnp.float32),
        grid=(grid,),
        in_specs=[pl.BlockSpec((tm, in_dim), lambda i: (i, 0))]
                 + [const_spec(a) for a in flat[1:]],
        out_specs=pl.BlockSpec((tm, n_p), lambda i: (i, 0)),
        compiler_params=pltpu.CompilerParams(
            dimension_semantics=("parallel",)),
        cost_estimate=pl.CostEstimate(
            flops=flops, transcendentals=0, bytes_accessed=bytes_accessed),
    )(*flat)

    if full_output:
        return out                       # (batch, 128): skip slice for serving
    return out[:, :output_dim]


# ---------------------------------------------------------------------------
# References for correctness checking.
# ---------------------------------------------------------------------------
def _reference_f32(x, params, eps=1e-5):
    """Eval-mode forward of the original module, pure f32 (dropout = identity)."""
    h = x
    for i in range(len(params["bns"])):
        w, b = params["linears"][i]
        gamma, beta, mean, var = params["bns"][i]
        h = jnp.maximum(h @ w + b, 0.0)
        h = (h - mean) / jnp.sqrt(var + eps) * gamma + beta
    w, b = params["linears"][-1]
    return h @ w + b


def _reference_folded(x, fused_params, output_dim):
    """Pure-JAX model of exactly what the kernel computes: folded BN, bf16
    weights AND bf16 inter-layer activations, f32 accumulation."""
    h = x.astype(jnp.bfloat16)
    for w, b in fused_params[:-1]:
        z = jnp.dot(h, w, preferred_element_type=jnp.float32)
        h = jnp.maximum(z + b, 0.0).astype(jnp.bfloat16)
    w, b = fused_params[-1]
    out = jnp.dot(h, w, preferred_element_type=jnp.float32) + b
    return out[:, :output_dim]


if __name__ == "__main__":
    key = jax.random.PRNGKey(0)
    input_dim, output_dim = 64, 96
    hidden_dims = (512, 256, 128)

    kx, kx2, kp = jax.random.split(key, 3)
    params = init_params(kp, input_dim, hidden_dims, output_dim)
    fused = fold_and_pad_params(params)

    # --- tiny serving-size batch (single grid step, partial tile) ----------
    batch = 8
    x = jax.random.normal(kx, (batch, input_dim), jnp.float32)
    out = jax.block_until_ready(
        direct_net_load_predictor(x, fused, output_dim=output_dim))
    assert out.shape == (batch, output_dim)
    assert jnp.allclose(out, _reference_folded(x, fused, output_dim),
                        atol=1e-3, rtol=1e-3), "mismatch vs folded bf16 reference"
    assert jnp.allclose(out, _reference_f32(x, params),
                        atol=5e-2, rtol=5e-2), "mismatch vs f32 module reference"

    # --- larger batch (multi-step grid + masked partial last tile) ---------
    batch2 = 300
    x2 = jax.random.normal(kx2, (batch2, input_dim), jnp.float32)
    out2 = jax.block_until_ready(
        direct_net_load_predictor(x2, fused, output_dim=output_dim))
    assert out2.shape == (batch2, output_dim)
    assert jnp.allclose(out2, _reference_folded(x2, fused, output_dim),
                        atol=1e-3, rtol=1e-3), "mismatch vs folded bf16 reference (b=300)"
    assert jnp.allclose(out2, _reference_f32(x2, params),
                        atol=5e-2, rtol=5e-2), "mismatch vs f32 module reference (b=300)"

    print("KERNEL_OK")
</pallas_src>

<mosaic_0001>
module attributes {stable_mosaic.version = 11 : i64} {
  func.func @_fused_mlp_kernel(%arg0: i32, %arg1: memref<16x64xbf16, #tpu.memory_space<vmem>>, %arg2: memref<64x512xbf16, #tpu.memory_space<vmem>>, %arg3: memref<1x512xf32, #tpu.memory_space<vmem>>, %arg4: memref<512x256xbf16, #tpu.memory_space<vmem>>, %arg5: memref<1x256xf32, #tpu.memory_space<vmem>>, %arg6: memref<256x128xbf16, #tpu.memory_space<vmem>>, %arg7: memref<1x128xf32, #tpu.memory_space<vmem>>, %arg8: memref<128x128xbf16, #tpu.memory_space<vmem>>, %arg9: memref<1x128xf32, #tpu.memory_space<vmem>>, %arg10: memref<16x128xf32, #tpu.memory_space<vmem>>) attributes {dimension_semantics = [#tpu.dimension_semantics<parallel>], iteration_bounds = array<i64: 1>, scalar_prefetch = 0 : i64, scratch_operands = 0 : i64, tpu.core_type = #tpu.core_type<tc>, window_params = [{transform_indices = @transform_0, window_bounds = array<i64: 16, 64>}, {pipeline_mode = #tpu.pipeline_mode<synchronous>, transform_indices = @transform_1, window_bounds = array<i64: 64, 512>}, {pipeline_mode = #tpu.pipeline_mode<synchronous>, transform_indices = @transform_2, window_bounds = array<i64: 1, 512>}, {pipeline_mode = #tpu.pipeline_mode<synchronous>, transform_indices = @transform_3, window_bounds = array<i64: 512, 256>}, {pipeline_mode = #tpu.pipeline_mode<synchronous>, transform_indices = @transform_4, window_bounds = array<i64: 1, 256>}, {pipeline_mode = #tpu.pipeline_mode<synchronous>, transform_indices = @transform_5, window_bounds = array<i64: 256, 128>}, {pipeline_mode = #tpu.pipeline_mode<synchronous>, transform_indices = @transform_6, window_bounds = array<i64: 1, 128>}, {pipeline_mode = #tpu.pipeline_mode<synchronous>, transform_indices = @transform_7, window_bounds = array<i64: 128, 128>}, {pipeline_mode = #tpu.pipeline_mode<synchronous>, transform_indices = @transform_8, window_bounds = array<i64: 1, 128>}, {transform_indices = @transform_9, window_bounds = array<i64: 16, 128>}]} {
    %c0 = arith.constant 0 : index
    %c0_0 = arith.constant 0 : index
    %0 = vector.load %arg1[%c0, %c0_0] : memref<16x64xbf16, #tpu.memory_space<vmem>>, vector<16x64xbf16>
    %c0_1 = arith.constant 0 : index
    %c0_2 = arith.constant 0 : index
    %1 = vector.load %arg2[%c0_1, %c0_2] : memref<64x512xbf16, #tpu.memory_space<vmem>>, vector<64x512xbf16>
    %cst = arith.constant dense<0.000000e+00> : vector<16x512xf32>
    %2 = tpu.matmul %0, %1, %cst {dimension_numbers = #tpu.dot_dimension_numbers<[1], [0], [0], [1], [0, 0, 1, 1], [], []>} : vector<16x64xbf16>, vector<64x512xbf16>, vector<16x512xf32> -> vector<16x512xf32>
    %c0_3 = arith.constant 0 : index
    %c0_4 = arith.constant 0 : index
    %3 = vector.load %arg3[%c0_3, %c0_4] : memref<1x512xf32, #tpu.memory_space<vmem>>, vector<1x512xf32>
    %4 = vector.broadcast %3 : vector<1x512xf32> to vector<16x512xf32>
    %5 = arith.addf %2, %4 : vector<16x512xf32>
    %cst_5 = arith.constant 0.000000e+00 : f32
    %6 = vector.broadcast %cst_5 : f32 to vector<16x512xf32>
    %7 = arith.maximumf %5, %6 : vector<16x512xf32>
    %8 = arith.truncf %7 : vector<16x512xf32> to vector<16x512xbf16>
    %c0_6 = arith.constant 0 : index
    %c0_7 = arith.constant 0 : index
    %9 = vector.load %arg4[%c0_6, %c0_7] : memref<512x256xbf16, #tpu.memory_space<vmem>>, vector<512x256xbf16>
    %cst_8 = arith.constant dense<0.000000e+00> : vector<16x256xf32>
    %10 = tpu.matmul %8, %9, %cst_8 {dimension_numbers = #tpu.dot_dimension_numbers<[1], [0], [0], [1], [0, 0, 1, 1], [], []>} : vector<16x512xbf16>, vector<512x256xbf16>, vector<16x256xf32> -> vector<16x256xf32>
    %c0_9 = arith.constant 0 : index
    %c0_10 = arith.constant 0 : index
    %11 = vector.load %arg5[%c0_9, %c0_10] : memref<1x256xf32, #tpu.memory_space<vmem>>, vector<1x256xf32>
    %12 = vector.broadcast %11 : vector<1x256xf32> to vector<16x256xf32>
    %13 = arith.addf %10, %12 : vector<16x256xf32>
    %cst_11 = arith.constant 0.000000e+00 : f32
    %14 = vector.broadcast %cst_11 : f32 to vector<16x256xf32>
    %15 = arith.maximumf %13, %14 : vector<16x256xf32>
    %16 = arith.truncf %15 : vector<16x256xf32> to vector<16x256xbf16>
    %c0_12 = arith.constant 0 : index
    %c0_13 = arith.constant 0 : index
    %17 = vector.load %arg6[%c0_12, %c0_13] : memref<256x128xbf16, #tpu.memory_space<vmem>>, vector<256x128xbf16>
    %cst_14 = arith.constant dense<0.000000e+00> : vector<16x128xf32>
    %18 = tpu.matmul %16, %17, %cst_14 {dimension_numbers = #tpu.dot_dimension_numbers<[1], [0], [0], [1], [0, 0, 1, 1], [], []>} : vector<16x256xbf16>, vector<256x128xbf16>, vector<16x128xf32> -> vector<16x128xf32>
    %c0_15 = arith.constant 0 : index
    %c0_16 = arith.constant 0 : index
    %19 = vector.load %arg7[%c0_15, %c0_16] : memref<1x128xf32, #tpu.memory_space<vmem>>, vector<1x128xf32>
    %20 = vector.broadcast %19 : vector<1x128xf32> to vector<16x128xf32>
    %21 = arith.addf %18, %20 : vector<16x128xf32>
    %cst_17 = arith.constant 0.000000e+00 : f32
    %22 = vector.broadcast %cst_17 : f32 to vector<16x128xf32>
    %23 = arith.maximumf %21, %22 : vector<16x128xf32>
    %24 = arith.truncf %23 : vector<16x128xf32> to vector<16x128xbf16>
    %c0_18 = arith.constant 0 : index
    %c0_19 = arith.constant 0 : index
    %25 = vector.load %arg8[%c0_18, %c0_19] : memref<128x128xbf16, #tpu.memory_space<vmem>>, vector<128x128xbf16>
    %cst_20 = arith.constant dense<0.000000e+00> : vector<16x128xf32>
    %26 = tpu.matmul %24, %25, %cst_20 {dimension_numbers = #tpu.dot_dimension_numbers<[1], [0], [0], [1], [0, 0, 1, 1], [], []>} : vector<16x128xbf16>, vector<128x128xbf16>, vector<16x128xf32> -> vector<16x128xf32>
    %c0_21 = arith.constant 0 : index
    %c0_22 = arith.constant 0 : index
    %27 = vector.load %arg9[%c0_21, %c0_22] : memref<1x128xf32, #tpu.memory_space<vmem>>, vector<1x128xf32>
    %28 = vector.broadcast %27 : vector<1x128xf32> to vector<16x128xf32>
    %29 = arith.addf %26, %28 : vector<16x128xf32>
    %c0_23 = arith.constant 0 : index
    %c0_24 = arith.constant 0 : index
    %30 = vector.load %arg10[%c0_23, %c0_24] : memref<16x128xf32, #tpu.memory_space<vmem>>, vector<16x128xf32>
    tpu.vector_store %arg10[%c0_23, %c0_24], %29 {strides = array<i32>} : memref<16x128xf32, #tpu.memory_space<vmem>>, vector<16x128xf32>,
    return
  }
  func.func @transform_0(%arg0: i32) -> (i32, i32) {
    %c0_i32 = arith.constant 0 : i32
    %c0_i32_0 = arith.constant 0 : i32
    return %arg0, %c0_i32 : i32, i32
  }
  func.func @transform_1(%arg0: i32) -> (i32, i32) {
    %c0_i32 = arith.constant 0 : i32
    %c0_i32_0 = arith.constant 0 : i32
    %c0_i32_1 = arith.constant 0 : i32
    return %c0_i32, %c0_i32_0 : i32, i32
  }
  func.func @transform_2(%arg0: i32) -> (i32, i32) {
    %c0_i32 = arith.constant 0 : i32
    %c0_i32_0 = arith.constant 0 : i32
    %c0_i32_1 = arith.constant 0 : i32
    return %c0_i32, %c0_i32_0 : i32, i32
  }
  func.func @transform_3(%arg0: i32) -> (i32, i32) {
    %c0_i32 = arith.constant 0 : i32
    %c0_i32_0 = arith.constant 0 : i32
    %c0_i32_1 = arith.constant 0 : i32
    return %c0_i32, %c0_i32_0 : i32, i32
  }
  func.func @transform_4(%arg0: i32) -> (i32, i32) {
    %c0_i32 = arith.constant 0 : i32
    %c0_i32_0 = arith.constant 0 : i32
    %c0_i32_1 = arith.constant 0 : i32
    return %c0_i32, %c0_i32_0 : i32, i32
  }
  func.func @transform_5(%arg0: i32) -> (i32, i32) {
    %c0_i32 = arith.constant 0 : i32
    %c0_i32_0 = arith.constant 0 : i32
    %c0_i32_1 = arith.constant 0 : i32
    return %c0_i32, %c0_i32_0 : i32, i32
  }
  func.func @transform_6(%arg0: i32) -> (i32, i32) {
    %c0_i32 = arith.constant 0 : i32
    %c0_i32_0 = arith.constant 0 : i32
    %c0_i32_1 = arith.constant 0 : i32
    return %c0_i32, %c0_i32_0 : i32, i32
  }
  func.func @transform_7(%arg0: i32) -> (i32, i32) {
    %c0_i32 = arith.constant 0 : i32
    %c0_i32_0 = arith.constant 0 : i32
    %c0_i32_1 = arith.constant 0 : i32
    return %c0_i32, %c0_i32_0 : i32, i32
  }
  func.func @transform_8(%arg0: i32) -> (i32, i32) {
    %c0_i32 = arith.constant 0 : i32
    %c0_i32_0 = arith.constant 0 : i32
    %c0_i32_1 = arith.constant 0 : i32
    return %c0_i32, %c0_i32_0 : i32, i32
  }
  func.func @transform_9(%arg0: i32) -> (i32, i32) {
    %c0_i32 = arith.constant 0 : i32
    %c0_i32_0 = arith.constant 0 : i32
    return %arg0, %c0_i32 : i32, i32
  }
}

</mosaic_0001>

<bundles_post_ra>
// kernel: direct_net_load_predictor.1
= control target key start
LH: loop header
LB: loop body
LE: loop exit
PB: predicated region body
PF: predicated region fallthrough
CT: control target
= control target key end

     0   :  { %14 = vsyncpa [#allocation3], 0  ;;  %s1657_s0 = inlined_call_operand.vmem [shape: bf16[8,64], index: 0, kind: input, shape index: {}]   ;;  %s1658_s1 = inlined_call_operand.hbm [shape: bf16[64,512], index: 1, kind: input, shape index: {}]   ;;  %s1659_s2 = inlined_call_operand.vmem [shape: f32[1,512], index: 2, kind: input, shape index: {}]   ;;  %s1660_s3 = inlined_call_operand.hbm [shape: bf16[512,256], index: 3, kind: input, shape index: {}]   ;;  %s1661_s4 = inlined_call_operand.vmem [shape: f32[1,256], index: 4, kind: input, shape index: {}]   ;;  %s1662_s5 = inlined_call_operand.hbm [shape: bf16[256,128], index: 5, kind: input, shape index: {}]   ;;  %s1663_s6 = inlined_call_operand.vmem [shape: f32[1,128], index: 6, kind: input, shape index: {}]   ;;  %s1664_s7 = inlined_call_operand.hbm [shape: bf16[128,128], index: 7, kind: input, shape index: {}]   ;;  %s1665_s8 = inlined_call_operand.vmem [shape: f32[1,128], index: 8, kind: input, shape index: {}]   ;;  %s1666_s9 = inlined_call_operand.hbm [shape: f32[8,128], index: 9, kind: output, shape index: {}]  }
   0x1   :  { %15 = vsyncpa [#allocation6], 0 }
   0x2   :  { %16 = vsyncpa [#allocation9], 0 }
   0x3   :  { %17 = vsyncpa [#allocation4], 0  ;;  %s1543_s30 = smov [#allocation5]  }
   0x4   :  { %s39_s10 = sshll.u32 %s1543_s30, 4  ;;  %s40_s10 = int_to_ptr.vmem [resolvable:$true] %s39_s10 }
   0x5   :  { %s1443_s11 = scalar_lea.vmem %s40_s10, 8192  ;;  %p1448_p1 = scmp.lt.s32.totalorder %s40_s10, %s40_s10 }
   0x6   :  { %p1444_p0 = scmp.ne.s32.totalorder %s40_s10, %s1443_s11  ;;  %p1449_p2 = scmp.lt.s32.totalorder %s1443_s11, %s1443_s11 }
   0x8   :  { %p1450_p3 = por %p1449_p2, %p1448_p1 }
   0xa   :  { %p1451_p4 = pnand %p1450_p3, %p1444_p0 }
   0xc   :  { %1454 = shalt.err (!%p1451_p4)
}
   0xd   :  { %s1544_s12 = smov 128   ;;  %s1545_s13 = smov 8  }
   0xe   :  { %45 = dma.hbm_to_vmem [thread:$0]  %s1660_s3, 8192, %s40_s10, [#allocation6], %s1544_s12, %s1544_s12, %s1545_s13  }
   0xf   :  { %s1546_s16 = smov [#allocation2]  }
  0x10   :  { %s25_s17 = sshll.u32 %s1546_s16, 4  ;;  %s26_s17 = int_to_ptr.vmem [resolvable:$true] %s25_s17 }
  0x11   :  { %s1463_s18 = scalar_lea.vmem %s26_s17, 2048  ;;  %p1468_p6 = scmp.lt.s32.totalorder %s26_s17, %s26_s17 }
  0x12   :  { %p1464_p5 = scmp.ne.s32.totalorder %s26_s17, %s1463_s18  ;;  %p1469_p7 = scmp.lt.s32.totalorder %s1463_s18, %s1463_s18 }
  0x14   :  { %p1470_p8 = por %p1469_p7, %p1468_p6 }
  0x16   :  { %p1471_p9 = pnand %p1470_p8, %p1464_p5 }
  0x18   :  { %1474 = shalt.err (!%p1471_p9)
}
  0x19   :  { %s1547_s19 = smov 256   ;;  %s1548_s20 = smov 16  }
  0x1a   :  { %31 = dma.hbm_to_vmem [thread:$0]  %s1658_s1, 2048, %s26_s17, [#allocation3], %s1547_s19, %s1547_s19, %s1548_s20  }
  0x1b   :  { %s1549_s23 = smov [#allocation7]  }
  0x1c   :  { %s53_s24 = sshll.u32 %s1549_s23, 4  ;;  %s54_s24 = int_to_ptr.vmem [resolvable:$true] %s53_s24 }
  0x1d   :  { %s1483_s3 = scalar_lea.vmem %s54_s24, 2048  ;;  %p1488_p11 = scmp.lt.s32.totalorder %s54_s24, %s54_s24 }
  0x1e   :  { %p1484_p10 = scmp.ne.s32.totalorder %s54_s24, %s1483_s3  ;;  %p1489_p12 = scmp.lt.s32.totalorder %s1483_s3, %s1483_s3 }
  0x20   :  { %p1490_p13 = por %p1489_p12, %p1488_p11 }
  0x22   :  { %p1491_p0 = pnand %p1490_p13, %p1484_p10 }
  0x24   :  { %1494 = shalt.err (!%p1491_p0)
}
  0x25   :  { %s1550_s25 = smov 64   ;;  %s1551_s26 = smov 4  }
  0x26   :  { %59 = dma.hbm_to_vmem [thread:$0]  %s1662_s5, 2048, %s54_s24, [#allocation6], %s1550_s25, %s1550_s25, %s1551_s26  }
  0x27   :  { %s1552_s29 = smov [#allocation8]  }
  0x28   :  { %s67_s30 = sshll.u32 %s1552_s29, 4  ;;  %s68_s30 = int_to_ptr.vmem [resolvable:$true] %s67_s30 }
  0x29   :  { %s1503_s1 = scalar_lea.vmem %s68_s30, 1024  ;;  %p1508_p2 = scmp.lt.s32.totalorder %s68_s30, %s68_s30 }
  0x2a   :  { %p1504_p1 = scmp.ne.s32.totalorder %s68_s30, %s1503_s1  ;;  %p1509_p3 = scmp.lt.s32.totalorder %s1503_s1, %s1503_s1 }
  0x2c   :  { %p1510_p4 = por %p1509_p3, %p1508_p2 }
  0x2e   :  { %p1511_p5 = pnand %p1510_p4, %p1504_p1 }
  0x30   :  { %1514 = shalt.err (!%p1511_p5)
}
  0x31   :  { %73 = dma.hbm_to_vmem [thread:$0]  %s1664_s7, 1024, %s68_s30, [#allocation9], %s1550_s25, %s1550_s25, %s1551_s26  }
  0x32   :  { %1535 = dma.done.wait [#allocation3], 2048  }
  0x33   :  { %1536 = vsyncadd [#allocation3], 4294965248 }
  0x34   :  { %1537 = dma.done.wait [#allocation6], 10240  }
  0x35   :  { %1538 = vsyncadd [#allocation6], 4294957056 }
  0x36   :  { %1539 = dma.done.wait [#allocation9], 1024  }
  0x37   :  { %1540 = vsyncadd [#allocation9], 4294966272  ;;  %v1553_v0 = vmov 0   ;;  %v1290_v1 = vld [vmem:[#allocation2 + $0x64] ss:$16 sps:$4 sm:$0xff]   ;;  %vm214_vm0 = vcmask 523264  }
  0x38   :  { %250 = vmatprep.mubr.bf16.mxu0 %v1553_v0  ;;  %293 = vmatprep.mubr.bf16.mxu1 %v1553_v0  ;;  %v1292_v2 = vld [vmem:[#allocation2 + $0x6c] ss:$16 sps:$4 sm:$0xff]   ;;  %v1294_v3 = vld [vmem:[#allocation2 + $0x60] ss:$16 sps:$4 sm:$0xff]   ;;  %v1295_v4 = vld [vmem:[#allocation2 + $0x68] ss:$16 sps:$4 sm:$0xff]  }
  0x39   :  { %226 = vmatprep.subr.bf16.mxu0 %v1290_v1  ;;  %269 = vmatprep.subr.bf16.mxu1 %v1292_v2  ;;  %v1296_v5 = vld [vmem:[#allocation2 + $0x44] ss:$16 sps:$4 sm:$0xff]   ;;  %v1298_v6 = vld [vmem:[#allocation2 + $0x4c] ss:$16 sps:$4 sm:$0xff]   ;;  %v1300_v7 = vld [vmem:[#allocation2 + $0x40] ss:$16 sps:$4 sm:$0xff]  }
  0x3a   :  { %227 = vmatpush1.bf16.msra.mxu0 %v1294_v3  ;;  %270 = vmatpush1.bf16.msra.mxu1 %v1295_v4  ;;  %v1301_v8 = vld [vmem:[#allocation2 + $0x48] ss:$16 sps:$4 sm:$0xff]   ;;  %v1302_v9 = vld [vmem:[#allocation2 + $0x24] ss:$16 sps:$4 sm:$0xff]   ;;  %v1304_v10 = vld [vmem:[#allocation2 + $0x2c] ss:$16 sps:$4 sm:$0xff]  }
  0x3b   :  { %228 = vmatprep.subr.bf16.mxu0 %v1296_v5  ;;  %271 = vmatprep.subr.bf16.mxu1 %v1298_v6  ;;  %v1306_v11 = vld [vmem:[#allocation2 + $0x20] ss:$16 sps:$4 sm:$0xff]   ;;  %v1307_v12 = vld [vmem:[#allocation2 + $0x28] ss:$16 sps:$4 sm:$0xff]   ;;  %v1308_v13 = vld [vmem:[#allocation2 + $0x4] ss:$16 sps:$4 sm:$0xff]  }
  0x3c   :  { %v1310_v14 = vld [vmem:[#allocation2 + $0xc] ss:$16 sps:$4 sm:$0xff]   ;;  %v1312_v15 = vld [vmem:[#allocation2] ss:$16 sps:$4 sm:$0xff]   ;;  %v1313_v16 = vld [vmem:[#allocation2 + $0x8] ss:$16 sps:$4 sm:$0xff]  }
  0x3d   :  { %v1317_v17 = vld [vmem:[#allocation5 + $0x74] ss:$8 sps:$4 sm:$0xff]   ;;  %v1314_v19 = vld [vmem:[%s1657_s0] sm:$0xff]   ;;  %v1315_v20 = vld [vmem:[#allocation5 + $0x70] ss:$8 sps:$4 sm:$0xff]   ;;  %vm1555_vm1 = vmmov 0  }
  0x3e   :  { %229 = vmatpush1.bf16.msra.mxu0 %v1300_v7  ;;  %272 = vmatpush1.bf16.msra.mxu1 %v1301_v8  ;;  %v1320_v18 = vld [vmem:[#allocation5 + $0x174] ss:$8 sps:$4 sm:$0xff]   ;;  %v1318_v21 = vld [vmem:[#allocation5 + $0x170] ss:$8 sps:$4 sm:$0xff]   ;;  %v1323_v22 = vld [vmem:[#allocation5 + $0x64] ss:$8 sps:$4 sm:$0xff]  }
  0x3f   :  { %230 = vmatprep.subr.bf16.mxu0 %v1302_v9  ;;  %273 = vmatprep.subr.bf16.mxu1 %v1304_v10  ;;  %v1326_v23 = vld [vmem:[#allocation5 + $0x164] ss:$8 sps:$4 sm:$0xff]   ;;  %v1321_v24 = vld [vmem:[#allocation5 + $0x60] ss:$8 sps:$4 sm:$0xff]   ;;  %v1329_v26 = vld [vmem:[#allocation5 + $0x54] ss:$8 sps:$4 sm:$0xff]  }
  0x40   :  { %v1324_v25 = vld [vmem:[#allocation5 + $0x160] ss:$8 sps:$4 sm:$0xff]   ;;  %v1332_v27 = vld [vmem:[#allocation5 + $0x154] ss:$8 sps:$4 sm:$0xff]   ;;  %v1327_v28 = vld [vmem:[#allocation5 + $0x50] ss:$8 sps:$4 sm:$0xff]  }
  0x41   :  { %v1330_v29 = vld [vmem:[#allocation5 + $0x150] ss:$8 sps:$4 sm:$0xff]   ;;  %v1335_v30 = vld [vmem:[#allocation5 + $0x44] ss:$8 sps:$4 sm:$0xff]   ;;  %v1333_v32 = vld [vmem:[#allocation5 + $0x40] ss:$8 sps:$4 sm:$0xff]  }
  0x42   :  { %231 = vmatpush1.bf16.msra.mxu0 %v1306_v11  ;;  %274 = vmatpush1.bf16.msra.mxu1 %v1307_v12  ;;  %v1338_v31 = vld [vmem:[#allocation5 + $0x144] ss:$8 sps:$4 sm:$0xff]   ;;  %v1336_v33 = vld [vmem:[#allocation5 + $0x140] ss:$8 sps:$4 sm:$0xff]   ;;  %v1341_v34 = vld [vmem:[#allocation5 + $0x34] ss:$8 sps:$4 sm:$0xff]  }
  0x43   :  { %232 = vmatprep.subr.bf16.mxu0 %v1308_v13  ;;  %275 = vmatprep.subr.bf16.mxu1 %v1310_v14  ;;  %v1344_v35 = vld [vmem:[#allocation5 + $0x134] ss:$8 sps:$4 sm:$0xff]   ;;  %v1339_v36 = vld [vmem:[#allocation5 + $0x30] ss:$8 sps:$4 sm:$0xff]   ;;  %v1347_v38 = vld [vmem:[#allocation5 + $0x24] ss:$8 sps:$4 sm:$0xff]  }
  0x44   :  { %v1342_v37 = vld [vmem:[#allocation5 + $0x130] ss:$8 sps:$4 sm:$0xff]   ;;  %v1350_v39 = vld [vmem:[#allocation5 + $0x124] ss:$8 sps:$4 sm:$0xff]   ;;  %v1345_v40 = vld [vmem:[#allocation5 + $0x20] ss:$8 sps:$4 sm:$0xff]  }
  0x45   :  { %v1348_v41 = vld [vmem:[#allocation5 + $0x120] ss:$8 sps:$4 sm:$0xff]   ;;  %v1353_v42 = vld [vmem:[#allocation5 + $0x14] ss:$8 sps:$4 sm:$0xff]   ;;  %v1351_v44 = vld [vmem:[#allocation5 + $0x10] ss:$8 sps:$4 sm:$0xff]  }
  0x46   :  { %233 = vmatpush1.bf16.msra.mxu0 %v1312_v15  ;;  %276 = vmatpush1.bf16.msra.mxu1 %v1313_v16  ;;  %v1356_v43 = vld [vmem:[#allocation5 + $0x114] ss:$8 sps:$4 sm:$0xff]   ;;  %v1354_v45 = vld [vmem:[#allocation5 + $0x110] ss:$8 sps:$4 sm:$0xff]   ;;  %v1359_v46 = vld [vmem:[#allocation5 + $0x4] ss:$8 sps:$4 sm:$0xff]  }
  0x47   :  { %712 = vmatprep.subr.bf16.mxu0 %v1317_v17  ;;  %755 = vmatprep.subr.bf16.mxu1 %v1320_v18  ;;  %v1362_v47 = vld [vmem:[#allocation5 + $0x104] ss:$8 sps:$4 sm:$0xff]   ;;  %v1357_v48 = vld [vmem:[#allocation5] ss:$8 sps:$4 sm:$0xff]   ;;  %v1365_v50 = vld [vmem:[#allocation5 + $0xf4] ss:$8 sps:$4 sm:$0xff]  }
  0x48   :  { %v1360_v49 = vld [vmem:[#allocation5 + $0x100] ss:$8 sps:$4 sm:$0xff]   ;;  %v1368_v51 = vld [vmem:[#allocation5 + $0x1f4] ss:$8 sps:$4 sm:$0xff]   ;;  %v1363_v52 = vld [vmem:[#allocation5 + $0xf0] ss:$8 sps:$4 sm:$0xff]  }
  0x49   :  { %1133 = vmatmul.mubr.msk.bf16.vlgmr.msra.gmra.mxu0 %vm214_vm0, %v1314_v19  ;;  %1134 = vmatmul.mubr.msk.bf16.vlgmr.msra.gmra.mxu1 %vm214_vm0, %v1314_v19  ;;  %v1366_v53 = vld [vmem:[#allocation5 + $0x1f0] ss:$8 sps:$4 sm:$0xff]   ;;  %v1371_v54 = vld [vmem:[#allocation5 + $0xe4] ss:$8 sps:$4 sm:$0xff]   ;;  %v1369_v56 = vld [vmem:[#allocation5 + $0xe0] ss:$8 sps:$4 sm:$0xff]   ;;  %v109_v19 = vlaneseq }
  0x4a   :  { %713 = vmatpush1.bf16.msra.mxu0 %v1315_v20  ;;  %756 = vmatpush1.bf16.msra.mxu1 %v1318_v21  ;;  %v1374_v55 = vld [vmem:[#allocation5 + $0x1e4] ss:$8 sps:$4 sm:$0xff]   ;;  %v1372_v57 = vld [vmem:[#allocation5 + $0x1e0] ss:$8 sps:$4 sm:$0xff]   ;;  %v1377_v58 = vld [vmem:[#allocation5 + $0xd4] ss:$8 sps:$4 sm:$0xff]  }
  0x4b   :  { %714 = vmatprep.subr.bf16.mxu0 %v1323_v22  ;;  %757 = vmatprep.subr.bf16.mxu1 %v1326_v23  ;;  %v1380_v59 = vld [vmem:[#allocation5 + $0x1d4] ss:$8 sps:$4 sm:$0xff]   ;;  %v1375_v60 = vld [vmem:[#allocation5 + $0xd0] ss:$8 sps:$4 sm:$0xff]   ;;  %v1383_v62 = vld [vmem:[#allocation5 + $0xc4] ss:$8 sps:$4 sm:$0xff]  }
  0x4c   :  { %v1378_v61 = vld [vmem:[#allocation5 + $0x1d0] ss:$8 sps:$4 sm:$0xff]   ;;  %v1386_v63 = vld [vmem:[#allocation5 + $0x1c4] ss:$8 sps:$4 sm:$0xff]   ;;  %v1381_v0 = vld [vmem:[#allocation5 + $0xc0] ss:$8 sps:$4 sm:$0xff]  }
  0x4d   :  { %v1384_v1 = vld [vmem:[#allocation5 + $0x1c0] ss:$8 sps:$4 sm:$0xff]   ;;  %v1389_v2 = vld [vmem:[#allocation5 + $0xb4] ss:$8 sps:$4 sm:$0xff]   ;;  %v1387_v4 = vld [vmem:[#allocation5 + $0xb0] ss:$8 sps:$4 sm:$0xff]  }
  0x4e   :  { %715 = vmatpush1.bf16.msra.mxu0 %v1321_v24  ;;  %758 = vmatpush1.bf16.msra.mxu1 %v1324_v25  ;;  %v1392_v3 = vld [vmem:[#allocation5 + $0x1b4] ss:$8 sps:$4 sm:$0xff]   ;;  %v1390_v5 = vld [vmem:[#allocation5 + $0x1b0] ss:$8 sps:$4 sm:$0xff]   ;;  %v1395_v6 = vld [vmem:[#allocation5 + $0xa4] ss:$8 sps:$4 sm:$0xff]  }
  0x4f   :  { %716 = vmatprep.subr.bf16.mxu0 %v1329_v26  ;;  %759 = vmatprep.subr.bf16.mxu1 %v1332_v27  ;;  %v1398_v7 = vld [vmem:[#allocation5 + $0x1a4] ss:$8 sps:$4 sm:$0xff]   ;;  %v1393_v8 = vld [vmem:[#allocation5 + $0xa0] ss:$8 sps:$4 sm:$0xff]   ;;  %v1401_v10 = vld [vmem:[#allocation5 + $0x94] ss:$8 sps:$4 sm:$0xff]  }
  0x50   :  { %v1396_v9 = vld [vmem:[#allocation5 + $0x1a0] ss:$8 sps:$4 sm:$0xff]   ;;  %v1404_v11 = vld [vmem:[#allocation5 + $0x194] ss:$8 sps:$4 sm:$0xff]   ;;  %v1399_v12 = vld [vmem:[#allocation5 + $0x90] ss:$8 sps:$4 sm:$0xff]  }
  0x51   :  { %v1402_v13 = vld [vmem:[#allocation5 + $0x190] ss:$8 sps:$4 sm:$0xff]   ;;  %v1407_v14 = vld [vmem:[#allocation5 + $0x84] ss:$8 sps:$4 sm:$0xff]   ;;  %v1405_v16 = vld [vmem:[#allocation5 + $0x80] ss:$8 sps:$4 sm:$0xff]  }
  0x52   :  { %717 = vmatpush1.bf16.msra.mxu0 %v1327_v28  ;;  %760 = vmatpush1.bf16.msra.mxu1 %v1330_v29  ;;  %v1410_v15 = vld [vmem:[#allocation5 + $0x184] ss:$8 sps:$4 sm:$0xff]   ;;  %v1408_v17 = vld [vmem:[#allocation5 + $0x180] ss:$8 sps:$4 sm:$0xff]   ;;  %v1411_v18 = vld [vmem:[#allocation7 + $0x78] sm:$0xff]   ;;  %v1625_v20 = vshrl.u32 %v109_v19, 7 }
  0x53   :  { %718 = vmatprep.subr.bf16.mxu0 %v1335_v30  ;;  %761 = vmatprep.subr.bf16.mxu1 %v1338_v31  ;;  %v107_v25 = vld [vmem:[%s1659_s2] sm:$0xf] }
  0x54   :  { %v115_v21 = vsub.s32 1, %v1625_v20  ;;  %v123_v22 = vsub.s32 3, %v1625_v20  ;;  %v111_v23 = vsub.s32 0, %v1625_v20  ;;  %v119_v24 = vsub.s32 2, %v1625_v20 }
  0x56   :  { %719 = vmatpush1.bf16.msra.mxu0 %v1333_v32  ;;  %762 = vmatpush1.bf16.msra.mxu1 %v1336_v33  ;;  %v116_v28 = vrot.slane %v107_v25, %v115_v21  ;;  %v124_v29 = vrot.slane %v107_v25, %v123_v22  ;;  %v112_v30 = vrot.slane %v107_v25, %v111_v23 }
  0x57   :  { %720 = vmatprep.subr.bf16.mxu0 %v1341_v34  ;;  %763 = vmatprep.subr.bf16.mxu1 %v1344_v35  ;;  %v120_v31 = vrot.slane %v107_v25, %v119_v24 }
  0x5a   :  { %721 = vmatpush1.bf16.msra.mxu0 %v1339_v36  ;;  %764 = vmatpush1.bf16.msra.mxu1 %v1342_v37 }
  0x5b   :  { %722 = vmatprep.subr.bf16.mxu0 %v1347_v38  ;;  %765 = vmatprep.subr.bf16.mxu1 %v1350_v39 }
  0x5e   :  { %723 = vmatpush1.bf16.msra.mxu0 %v1345_v40  ;;  %766 = vmatpush1.bf16.msra.mxu1 %v1348_v41 }
  0x5f   :  { %724 = vmatprep.subr.bf16.mxu0 %v1353_v42  ;;  %767 = vmatprep.subr.bf16.mxu1 %v1356_v43 }
  0x62   :  { %725 = vmatpush1.bf16.msra.mxu0 %v1351_v44  ;;  %768 = vmatpush1.bf16.msra.mxu1 %v1354_v45 }
  0x63   :  { %726 = vmatprep.subr.bf16.mxu0 %v1359_v46  ;;  %769 = vmatprep.subr.bf16.mxu1 %v1362_v47 }
  0x66   :  { %727 = vmatpush1.bf16.msra.mxu0 %v1357_v48  ;;  %770 = vmatpush1.bf16.msra.mxu1 %v1360_v49 }
  0x67   :  { %728 = vmatprep.subr.bf16.mxu0 %v1365_v50  ;;  %771 = vmatprep.subr.bf16.mxu1 %v1368_v51 }
  0x6a   :  { %729 = vmatpush2.bf16.msra.mxu0 %v1363_v52  ;;  %772 = vmatpush2.bf16.msra.mxu1 %v1366_v53 }
  0x6b   :  { %730 = vmatprep.subr.bf16.mxu0 %v1371_v54  ;;  %773 = vmatprep.subr.bf16.mxu1 %v1374_v55 }
  0x6e   :  { %731 = vmatpush2.bf16.msra.mxu0 %v1369_v56  ;;  %774 = vmatpush2.bf16.msra.mxu1 %v1372_v57  ;;  %v1412_v56 = vld [vmem:[#allocation7 + $0x38] sm:$0xff]  }
  0x6f   :  { %732 = vmatprep.subr.bf16.mxu0 %v1377_v58  ;;  %775 = vmatprep.subr.bf16.mxu1 %v1380_v59  ;;  %v1413_v59 = vld [vmem:[#allocation7 + $0x70] sm:$0xff]  }
  0x72   :  { %733 = vmatpush2.bf16.msra.mxu0 %v1375_v60  ;;  %776 = vmatpush2.bf16.msra.mxu1 %v1378_v61  ;;  %v1414_v60 = vld [vmem:[#allocation7 + $0x30] sm:$0xff]   ;;  %v1415_v61 = vld [vmem:[#allocation7 + $0x68] sm:$0xff]  }
  0x73   :  { %734 = vmatprep.subr.bf16.mxu0 %v1383_v62  ;;  %777 = vmatprep.subr.bf16.mxu1 %v1386_v63  ;;  %v1416_v62 = vld [vmem:[#allocation7 + $0x28] sm:$0xff]   ;;  %v1417_v63 = vld [vmem:[#allocation7 + $0x60] sm:$0xff]  }
  0x76   :  { %735 = vmatpush2.bf16.msra.mxu0 %v1381_v0  ;;  %778 = vmatpush2.bf16.msra.mxu1 %v1384_v1  ;;  %v1418_v0 = vld [vmem:[#allocation7 + $0x20] sm:$0xff]   ;;  %v1419_v1 = vld [vmem:[#allocation7 + $0x58] sm:$0xff]  }
  0x77   :  { %736 = vmatprep.subr.bf16.mxu0 %v1389_v2  ;;  %779 = vmatprep.subr.bf16.mxu1 %v1392_v3  ;;  %v1420_v2 = vld [vmem:[#allocation7 + $0x18] sm:$0xff]   ;;  %v1421_v3 = vld [vmem:[#allocation7 + $0x50] sm:$0xff]  }
  0x7a   :  { %737 = vmatpush2.bf16.msra.mxu0 %v1387_v4  ;;  %780 = vmatpush2.bf16.msra.mxu1 %v1390_v5  ;;  %v1422_v4 = vld [vmem:[#allocation7 + $0x10] sm:$0xff]   ;;  %v1423_v5 = vld [vmem:[#allocation7 + $0x48] sm:$0xff]  }
  0x7b   :  { %738 = vmatprep.subr.bf16.mxu0 %v1395_v6  ;;  %781 = vmatprep.subr.bf16.mxu1 %v1398_v7  ;;  %v1424_v6 = vld [vmem:[#allocation7 + $0x8] sm:$0xff]   ;;  %v1425_v7 = vld [vmem:[#allocation7 + $0x40] sm:$0xff]  }
  0x7e   :  { %739 = vmatpush2.bf16.msra.mxu0 %v1393_v8  ;;  %782 = vmatpush2.bf16.msra.mxu1 %v1396_v9  ;;  %v1426_v8 = vld [vmem:[#allocation7] sm:$0xff]   ;;  %v1427_v9 = vld [vmem:[#allocation8 + $0x38] sm:$0xff]  }
  0x7f   :  { %740 = vmatprep.subr.bf16.mxu0 %v1401_v10  ;;  %783 = vmatprep.subr.bf16.mxu1 %v1404_v11  ;;  %v1554_v10 = vmov 0.0   ;;  %v1428_v11 = vld [vmem:[#allocation8 + $0x30] sm:$0xff]  }
  0x82   :  { %741 = vmatpush2.bf16.msra.mxu0 %v1399_v12  ;;  %784 = vmatpush2.bf16.msra.mxu1 %v1402_v13  ;;  %v1429_v12 = vld [vmem:[#allocation8 + $0x28] sm:$0xff]   ;;  %v1430_v13 = vld [vmem:[#allocation8 + $0x20] sm:$0xff]  }
  0x83   :  { %742 = vmatprep.subr.bf16.mxu0 %v1407_v14  ;;  %785 = vmatprep.subr.bf16.mxu1 %v1410_v15  ;;  %v380_v14 = vld [vmem:[%s1661_s4] sm:$0x3] }
  0x84   :  { %v389_v15 = vrot.slane %v380_v14, %v115_v21 }
  0x86   :  { %743 = vmatpush2.bf16.msra.mxu0 %v1405_v16  ;;  %786 = vmatpush2.bf16.msra.mxu1 %v1408_v17  ;;  %v385_v16 = vrot.slane %v380_v14, %v111_v23 }
  0x87   :  { %1225 = vmatprep.subr.bf16.mxu0 %v1411_v18  ;;  %1256 = vmatprep.subr.bf16.mxu1 %v1554_v10 }
 0x109   :  { %v252_v26 = vpop.f32.mrf.mxu0  ;;  %v295_v27 = vpop.f32.mrf.mxu1 }
 0x10a   :  { %v253_v40 = vadd.f32 %v252_v26, %v112_v30  ;;  %v296_v41 = vadd.f32 %v295_v27, %v120_v31 }
 0x10b   :  { %v254_v32 = vpop.f32.mrf.mxu0  ;;  %v297_v33 = vpop.f32.mrf.mxu1 }
 0x10c   :  { %v255_v36 = vadd.f32 %v254_v32, %v116_v28  ;;  %v298_v37 = vadd.f32 %v297_v33, %v124_v29  ;;  %v304_v52 = vmax.f32 %v253_v40, 0.0  ;;  %v306_v53 = vmax.f32 %v296_v41, 0.0  ;;  %v1432_v40 = vld [vmem:[#allocation8 + $0x10] sm:$0xff]   ;;  %v1433_v41 = vld [vmem:[#allocation8 + $0x8] sm:$0xff]  }
 0x10d   :  { %v256_v34 = vpop.f32.mrf.mxu0  ;;  %v299_v35 = vpop.f32.mrf.mxu1 }
 0x10e   :  { %v257_v38 = vadd.f32 %v256_v34, %v112_v30  ;;  %v300_v39 = vadd.f32 %v299_v35, %v120_v31  ;;  %v305_v48 = vmax.f32 %v255_v36, 0.0  ;;  %v307_v49 = vmax.f32 %v298_v37, 0.0 }
 0x10f   :  { %v258_v42 = vpop.f32.mrf.mxu0  ;;  %v301_v43 = vpop.f32.mrf.mxu1 }
 0x110   :  { %v259_v44 = vadd.f32 %v258_v42, %v116_v28  ;;  %v302_v45 = vadd.f32 %v301_v43, %v124_v29  ;;  %v308_v46 = vmax.f32 %v257_v38, 0.0  ;;  %v310_v47 = vmax.f32 %v300_v39, 0.0  ;;  %v1431_v39 = vld [vmem:[#allocation8 + $0x18] sm:$0xff]   ;;  %v1434_v42 = vld [vmem:[#allocation8] sm:$0xff]  }
 0x112   :  { %v309_v50 = vmax.f32 %v259_v44, 0.0  ;;  %v311_v51 = vmax.f32 %v302_v45, 0.0  ;;  %v312_v57 = vpack.c.bf16 %v308_v46, %v304_v52  ;;  %v314_v58 = vpack.c.bf16 %v310_v47, %v306_v53  ;;  %v1199_v46 = vld [vmem:[%s1663_s6] ss:$0 sm:$0xff] }
 0x114   :  { %v313_v54 = vpack.c.bf16 %v309_v50, %v305_v48  ;;  %v315_v55 = vpack.c.bf16 %v311_v51, %v307_v49 }
 0x116   :  { %744 = vmatprep.mubr.bf16.mxu0 %v313_v54  ;;  %787 = vmatprep.mubr.bf16.mxu1 %v315_v55  ;;  %v1216_v55 = vld [vmem:[%s1665_s8] ss:$0 sm:$0xff] }
 0x117   :  { %745 = vmatmul.mubr.bf16.vlgmr.msra.gmra.mxu0 %v312_v57  ;;  %788 = vmatmul.mubr.bf16.vlgmr.msra.gmra.mxu1 %v314_v58 }
 0x118   :  { %1226 = vmatpush3.bf16.msra.mxu0 %v1412_v56  ;;  %1257 = vmatpush3.bf16.msra.mxu1 %v1427_v9 }
 0x119   :  { %1227 = vmatprep.subr.bf16.mxu0 %v1413_v59  ;;  %1258 = vmatprep.subr.bf16.mxu1 %v1554_v10 }
 0x11a   :  { %1272 = vmatprep.mubr.msk.bf16.mxu1 %vm1555_vm1, %v1554_v10 }
 0x11c   :  { %1228 = vmatpush3.bf16.msra.mxu0 %v1414_v60  ;;  %1259 = vmatpush3.bf16.msra.mxu1 %v1428_v11 }
 0x11d   :  { %1229 = vmatprep.subr.bf16.mxu0 %v1415_v61  ;;  %1260 = vmatprep.subr.bf16.mxu1 %v1554_v10 }
 0x120   :  { %1230 = vmatpush3.bf16.msra.mxu0 %v1416_v62  ;;  %1261 = vmatpush3.bf16.msra.mxu1 %v1429_v12 }
 0x121   :  { %1231 = vmatprep.subr.bf16.mxu0 %v1417_v63  ;;  %1262 = vmatprep.subr.bf16.mxu1 %v1554_v10 }
 0x124   :  { %1232 = vmatpush3.bf16.msra.mxu0 %v1418_v0  ;;  %1263 = vmatpush3.bf16.msra.mxu1 %v1430_v13 }
 0x125   :  { %1233 = vmatprep.subr.bf16.mxu0 %v1419_v1  ;;  %1264 = vmatprep.subr.bf16.mxu1 %v1554_v10 }
 0x128   :  { %1234 = vmatpush3.bf16.msra.mxu0 %v1420_v2  ;;  %1265 = vmatpush3.bf16.msra.mxu1 %v1431_v39 }
 0x129   :  { %1235 = vmatprep.subr.bf16.mxu0 %v1421_v3  ;;  %1266 = vmatprep.subr.bf16.mxu1 %v1554_v10 }
 0x12c   :  { %1236 = vmatpush3.bf16.msra.mxu0 %v1422_v4  ;;  %1267 = vmatpush3.bf16.msra.mxu1 %v1432_v40 }
 0x12d   :  { %1237 = vmatprep.subr.bf16.mxu0 %v1423_v5  ;;  %1268 = vmatprep.subr.bf16.mxu1 %v1554_v10 }
 0x130   :  { %1238 = vmatpush3.bf16.msra.mxu0 %v1424_v6  ;;  %1269 = vmatpush3.bf16.msra.mxu1 %v1433_v41 }
 0x131   :  { %1239 = vmatprep.subr.bf16.mxu0 %v1425_v7  ;;  %1270 = vmatprep.subr.bf16.mxu1 %v1554_v10 }
 0x134   :  { %1240 = vmatpush3.bf16.msra.mxu0 %v1426_v8  ;;  %1271 = vmatpush3.bf16.msra.mxu1 %v1434_v42 }
 0x1d7   :  { %v746_v17 = vpop.f32.mrf.mxu0  ;;  %v789_v18 = vpop.f32.mrf.mxu1 }
 0x1d8   :  { %v747_v25 = vadd.f32 %v746_v17, %v385_v16 }
 0x1d9   :  { %v748_v19 = vpop.f32.mrf.mxu0  ;;  %v791_v22 = vpop.f32.mrf.mxu1 }
 0x1da   :  { %v749_v24 = vadd.f32 %v748_v19, %v389_v15  ;;  %v790_v33 = vadd.f32 %v789_v18, %v747_v25 }
 0x1db   :  { %v750_v26 = vpop.f32.mrf.mxu0  ;;  %v793_v27 = vpop.f32.mrf.mxu1 }
 0x1dc   :  { %v751_v28 = vadd.f32 %v750_v26, %v385_v16  ;;  %v792_v30 = vadd.f32 %v791_v22, %v749_v24  ;;  %v798_v23 = vmax.f32 %v790_v33, 0.0 }
 0x1dd   :  { %v752_v29 = vpop.f32.mrf.mxu0  ;;  %v795_v34 = vpop.f32.mrf.mxu1 }
 0x1de   :  { %v794_v31 = vadd.f32 %v793_v27, %v751_v28  ;;  %v753_v32 = vadd.f32 %v752_v29, %v389_v15  ;;  %v799_v36 = vmax.f32 %v792_v30, 0.0 }
 0x1e0   :  { %v796_v35 = vadd.f32 %v795_v34, %v753_v32  ;;  %v800_v21 = vmax.f32 %v794_v31, 0.0 }
 0x1e2   :  { %v801_v20 = vmax.f32 %v796_v35, 0.0  ;;  %v802_v38 = vpack.c.bf16 %v800_v21, %v798_v23 }
 0x1e4   :  { %v803_v37 = vpack.c.bf16 %v801_v20, %v799_v36 }
 0x1e6   :  { %971 = vmatprep.mubr.bf16.mxu0 %v803_v37 }
 0x1e7   :  { %972 = vmatmul.mubr.bf16.vlgmr.msra.gmra.mxu0 %v802_v38 }
 0x2a7   :  { %v1241_v43 = vpop.f32.mrf.mxu0 }
 0x2a9   :  { %v1242_v44 = vpop.f32.mrf.mxu0 }
 0x2aa   :  { %v1243_v45 = vadd.f32 %v1242_v44, %v1241_v43 }
 0x2ab   :  { %v1244_v47 = vpop.f32.mrf.mxu0 }
 0x2ac   :  { %v974_v49 = vadd.f32 %v1243_v45, %v1199_v46 }
 0x2ad   :  { %v1245_v48 = vpop.f32.mrf.mxu0 }
 0x2ae   :  { %v1246_v50 = vadd.f32 %v1245_v48, %v1244_v47  ;;  %v980_v52 = vmax.f32 %v974_v49, 0.0 }
 0x2b0   :  { %v977_v51 = vadd.f32 %v1246_v50, %v1199_v46 }
 0x2b2   :  { %v981_v53 = vmax.f32 %v977_v51, 0.0 }
 0x2b4   :  { %v982_v54 = vpack.c.bf16 %v981_v53, %v980_v52 }
 0x2b6   :  { %1273 = vmatmul.mubr.bf16.vlgmr.msra.gmra.mxu1 %v982_v54 }
 0x376   :  { %v1088_v56 = vpop.f32.mrf.mxu1 }
 0x377   :  { %v1089_v57 = vadd.f32 %v1216_v55, %v1088_v56 }
 0x378   :  { %v1274_v58 = vpop.f32.mrf.mxu1 }
 0x379   :  { %1095 = vst [vmem:[#allocation10] sm:$0xff] %v1089_v57 }
 0x37a   :  { %v1091_v59 = vpop.f32.mrf.mxu1 }
 0x37b   :  { %v1092_v60 = vadd.f32 %v1216_v55, %v1091_v59 }
 0x37c   :  { %v1275_v61 = vpop.f32.mrf.mxu1 }
 0x37d   :  { %1096 = vst [vmem:[#allocation10 + $0x8] sm:$0xff] %v1092_v60 }
 0x37e   :  { %1101 = vsyncadd [#allocation4], 128  ;;  %s1556_s6 = smov [#allocation10]  }
 0x37f   :  { %s1102_s19 = sshll.u32 %s1556_s6, 4  ;;  %s1103_s19 = int_to_ptr.vmem [resolvable:$true] %s1102_s19 }
 0x380   :  { %s1515_s20 = scalar_lea.vmem %s1103_s19, 128  ;;  %s1519_s21 = scalar_lea.vmem %s1103_s19, 256 }
 0x381   :  { %p1516_p6 = scmp.ne.s32.totalorder %s1103_s19, %s1515_s20  ;;  %p1520_p7 = scmp.lt.s32.totalorder %s1103_s19, %s1103_s19 }
 0x382   :  { %p1521_p8 = scmp.lt.s32.totalorder %s1519_s21, %s1515_s20 }
 0x384   :  { %p1522_p9 = por %p1521_p8, %p1520_p7 }
 0x386   :  { %p1523_p10 = pnand %p1522_p9, %p1516_p6 }
 0x388   :  { %1526 = shalt.err (!%p1523_p10)
}
 0x389   :  { %1108 = dma.vmem_to_hbm [thread:$0]  %s1103_s19, 128, %s1666_s9, [#allocation4], %s1544_s12, %s1544_s12, %s1545_s13  }
 0x38a   :  { %1541 = dma.done.wait [#allocation4], 256  }
 0x38b   :  { %1542 = vsyncadd [#allocation4], 4294967040 }
 0x38c   :  { %1112 = vsyncpa [#allocation3], 1 }
 0x38d   :  { %1113 = vsyncpa [#allocation6], 1 }
 0x38e   :  { %1114 = vsyncpa [#allocation9], 1 }
 0x38f   :  { %1115 = vsyncpa [#allocation4], 1 }

</bundles_post_ra>
